<compile_context>
chip_gen: v6e
topology: v6e:2x2x1
jax: 0.10.0
libtpu: 0.0.40
codegen_flags: <defaults>
</compile_context>

<pallas_src>
import jax
import jax.numpy as jnp
from jax.experimental import pallas as pl
from jax.experimental.pallas import tpu as pltpu

_F32 = jnp.finfo(jnp.float32)


def _masked_l1_kernel(inp_ref, tgt_ref, msk_ref, num_ref, den_ref):
    # Blocks: inp/tgt (1, C, T) native dtype, msk (1, 1, T) bf16.
    # Outputs (1, 1, 128) f32, accumulated across the spatial-tile grid axis.
    t = pl.program_id(1)

    inp = inp_ref[0].astype(jnp.float32)      # (C, T)
    tgt = tgt_ref[0].astype(jnp.float32)      # (C, T)
    m_up = msk_ref[0].astype(jnp.float32)     # (1, T) nearest-upsampled patch mask

    # finite_mask = isfinite(target).all(dim=channel)  (NaN fails both compares)
    finite_elem = ((tgt >= _F32.min) & (tgt <= _F32.max)).astype(jnp.float32)
    finite = jnp.min(finite_elem, axis=0, keepdims=True)          # (1, T) in {0,1}

    # target = nan_to_num(target): nan -> 0, +/-inf -> finfo max/min
    tgt = jnp.where(tgt == tgt, tgt, jnp.float32(0.0))
    tgt = jnp.clip(tgt, _F32.min, _F32.max)

    # Sum over channels; the 1/C of the channel mean is applied on the host.
    loss_csum = jnp.sum(jnp.abs(inp - tgt), axis=0, keepdims=True)  # (1, T)

    m = m_up * finite
    lm = loss_csum * m
    lm = jnp.where(lm == lm, lm, jnp.float32(0.0))                  # nansum semantics

    @pl.when(t == 0)
    def _():
        num_ref[...] = jnp.zeros_like(num_ref)
        den_ref[...] = jnp.zeros_like(den_ref)

    num_ref[...] += jnp.sum(lm)
    den_ref[...] += jnp.sum(m)


def _l1_sum_kernel(inp_ref, tgt_ref, sum_ref):
    # mask=None path: per-batch sum of |input - nan_to_num(target)|, tiled spatially.
    t = pl.program_id(1)
    inp = inp_ref[0].astype(jnp.float32)
    tgt = tgt_ref[0].astype(jnp.float32)
    tgt = jnp.where(tgt == tgt, tgt, jnp.float32(0.0))
    tgt = jnp.clip(tgt, _F32.min, _F32.max)

    @pl.when(t == 0)
    def _():
        sum_ref[...] = jnp.zeros_like(sum_ref)

    sum_ref[...] += jnp.sum(jnp.abs(inp - tgt))


def _pick_tile(hw, c, esize, target_bytes=2 << 20):
    """Largest lane-dense tile T (multiple of 128 dividing hw, or hw itself)
    such that one (C, T) input block stays around `target_bytes`."""
    t_max = max(128, target_bytes // max(1, c * esize))
    if hw <= t_max:
        return hw
    t = (min(t_max, hw) // 128) * 128
    while t >= 128:
        if hw % t == 0:
            return t
        t -= 128
    return hw  # fallback: whole image per step (last dim == full array dim)


def masked_l1_loss(inp, tgt, mask=None, *, patch_size=16, stride=1, norm_pix=False):
    B, C, H, W = inp.shape
    sf = patch_size // stride
    nh, nw = H // sf, W // sf
    HW = H * W

    if norm_pix:
        # TODO(synk): fuse norm_pix per-patch normalization into the Pallas kernel
        # to avoid the extra HBM passes of this patchify/transpose prologue.
        t = tgt.reshape(B, C, nh, sf, nw, sf).astype(jnp.float32)
        t = jnp.transpose(t, (0, 2, 4, 3, 5, 1)).reshape(B, nh * nw, sf * sf * C)
        mean = t.mean(axis=-1, keepdims=True)
        var = t.var(axis=-1, ddof=1, keepdims=True)   # unbiased, like torch .var()
        t = (t - mean) / jnp.sqrt(var + 1e-6)
        t = t.reshape(B, nh, nw, sf, sf, C)
        tgt = jnp.transpose(t, (0, 5, 1, 3, 2, 4)).reshape(B, C, H, W).astype(tgt.dtype)

    # Lane-dense layout (free reshape), keep native dtype (cast in-kernel).
    inp3 = inp.reshape(B, C, HW)
    tgt3 = tgt.reshape(B, C, HW)

    esize = max(inp3.dtype.itemsize, tgt3.dtype.itemsize)
    T = _pick_tile(HW, C, esize)
    nT = HW // T

    block_bytes = C * T * (inp3.dtype.itemsize + tgt3.dtype.itemsize) + 2 * T
    vmem_limit = int(min(64 << 20, max(32 << 20, 4 * block_bytes + (1 << 20))))
    cparams = pltpu.CompilerParams(
        dimension_semantics=("parallel", "arbitrary"),
        vmem_limit_bytes=vmem_limit,
    )

    if mask is None:
        sums = pl.pallas_call(
            _l1_sum_kernel,
            out_shape=jax.ShapeDtypeStruct((B, 1, 128), jnp.float32),
            grid_spec=pltpu.PrefetchScalarGridSpec(
                num_scalar_prefetch=0,
                grid=(B, nT),
                in_specs=[
                    pl.BlockSpec((1, C, T), lambda b, t: (b, 0, t)),
                    pl.BlockSpec((1, C, T), lambda b, t: (b, 0, t)),
                ],
                out_specs=pl.BlockSpec((1, 1, 128), lambda b, t: (b, 0, 0)),
            ),
            compiler_params=cparams,
        )(inp3, tgt3)
        return jnp.sum(sums[:, 0, 0]) / (B * C * H * W)

    # Nearest upsample of mask (B, nh*nw) -> flat (B, 1, H*W), stored as bf16
    # ({0,1} exact) to halve the side HBM traffic of this auxiliary array.
    mask_f = mask.reshape(B, nh, nw).astype(jnp.bfloat16)
    m_up = jnp.broadcast_to(
        mask_f[:, :, None, :, None], (B, nh, sf, nw, sf)
    ).reshape(B, 1, HW)

    num, den = pl.pallas_call(
        _masked_l1_kernel,
        out_shape=(
            jax.ShapeDtypeStruct((B, 1, 128), jnp.float32),
            jax.ShapeDtypeStruct((B, 1, 128), jnp.float32),
        ),
        grid_spec=pltpu.PrefetchScalarGridSpec(
            num_scalar_prefetch=0,
            grid=(B, nT),
            in_specs=[
                pl.BlockSpec((1, C, T), lambda b, t: (b, 0, t)),
                pl.BlockSpec((1, C, T), lambda b, t: (b, 0, t)),
                pl.BlockSpec((1, 1, T), lambda b, t: (b, 0, t)),
            ],
            out_specs=(
                pl.BlockSpec((1, 1, 128), lambda b, t: (b, 0, 0)),
                pl.BlockSpec((1, 1, 128), lambda b, t: (b, 0, 0)),
            ),
        ),
        compiler_params=cparams,
    )(inp3, tgt3, m_up)

    num = num[:, 0, 0]
    den = den[:, 0, 0]
    per_b = (num / jnp.float32(C)) / (den + 1e-5)   # fold channel-mean 1/C here

    # nanmean over batch
    valid = per_b == per_b
    loss = jnp.sum(jnp.where(valid, per_b, 0.0)) / jnp.maximum(
        jnp.sum(valid.astype(jnp.float32)), 1.0
    )
    # torch returns tensor(0) (int) when mask.sum()==0; we return float 0.0.
    return jnp.where(jnp.sum(mask.astype(jnp.float32)) == 0, jnp.float32(0.0), loss)


def _reference(inp, tgt, mask, sf):
    # pure-JAX reference mirroring the PyTorch forward (masked path, norm_pix=False)
    B, C, H, W = inp.shape
    nh, nw = H // sf, W // sf
    finite = jnp.all(jnp.isfinite(tgt), axis=1).astype(jnp.float32)
    t = jnp.nan_to_num(tgt)
    loss = jnp.abs(inp - t).mean(axis=1)
    m = mask.astype(jnp.float32).reshape(B, nh, nw)
    m_up = jnp.broadcast_to(m[:, :, None, :, None], (B, nh, sf, nw, sf)).reshape(B, H, W)
    m_up = m_up * finite
    loss = loss * m_up
    num = jnp.sum(jnp.where(jnp.isnan(loss), 0.0, loss).reshape(B, -1), axis=1)
    den = m_up.reshape(B, -1).sum(axis=1) + 1e-5
    return jnp.nanmean(num / den)


if __name__ == "__main__":
    key = jax.random.PRNGKey(0)
    B, C, H, W = 2, 4, 16, 16
    patch_size, stride = 16, 4                 # scale_factor = 4 -> nh = nw = 4
    sf = patch_size // stride
    nh, nw = H // sf, W // sf

    k1, k2, k3 = jax.random.split(key, 3)
    inp = jax.random.normal(k1, (B, C, H, W), jnp.float32)
    tgt = jax.random.normal(k2, (B, C, H, W), jnp.float32)
    # inject non-finite target pixels to exercise finite_mask / nan_to_num
    tgt = tgt.at[0, 1, 3, 5].set(jnp.nan)
    tgt = tgt.at[1, 0, 10, 2].set(jnp.inf)
    mask = (jax.random.uniform(k3, (B, nh * nw)) > 0.5).astype(jnp.float32)

    loss = masked_l1_loss(inp, tgt, mask, patch_size=patch_size, stride=stride,
                          norm_pix=False)
    jax.block_until_ready(loss)

    ref = _reference(inp, tgt, mask, sf)
    assert jnp.allclose(loss, ref, atol=1e-5, rtol=1e-5), (loss, ref)

    # also exercise the mask=None path
    loss2 = masked_l1_loss(inp, tgt, None, patch_size=patch_size, stride=stride)
    jax.block_until_ready(loss2)
    ref2 = jnp.mean(jnp.abs(inp - jnp.nan_to_num(tgt)))
    assert jnp.allclose(loss2, ref2, atol=1e-6, rtol=1e-4), (loss2, ref2)

    print("KERNEL_OK")
</pallas_src>

<mosaic_0001>
module attributes {stable_mosaic.version = 11 : i64} {
  func.func @_masked_l1_kernel(%arg0: i32, %arg1: i32, %arg2: memref<1x4x256xf32, #tpu.memory_space<vmem>>, %arg3: memref<1x4x256xf32, #tpu.memory_space<vmem>>, %arg4: memref<1x1x256xbf16, #tpu.memory_space<vmem>>, %arg5: memref<1x1x128xf32, #tpu.memory_space<vmem>>, %arg6: memref<1x1x128xf32, #tpu.memory_space<vmem>>) attributes {dimension_semantics = [#tpu.dimension_semantics<parallel>, #tpu.dimension_semantics<arbitrary>], iteration_bounds = array<i64: 2, 1>, scalar_prefetch = 0 : i64, scratch_operands = 0 : i64, tpu.core_type = #tpu.core_type<tc>, window_params = [{transform_indices = @transform_0, window_bounds = array<i64: 1, 4, 256>}, {transform_indices = @transform_1, window_bounds = array<i64: 1, 4, 256>}, {transform_indices = @transform_2, window_bounds = array<i64: 1, 1, 256>}, {transform_indices = @transform_3, window_bounds = array<i64: 1, 1, 128>}, {transform_indices = @transform_4, window_bounds = array<i64: 1, 1, 128>}]} {
    %c0 = arith.constant 0 : index
    %c0_0 = arith.constant 0 : index
    %c0_1 = arith.constant 0 : index
    %0 = vector.load %arg2[%c0, %c0_0, %c0_1] : memref<1x4x256xf32, #tpu.memory_space<vmem>>, vector<1x4x256xf32>
    %1 = vector.shape_cast %0 : vector<1x4x256xf32> to vector<4x256xf32>
    %c0_2 = arith.constant 0 : index
    %c0_3 = arith.constant 0 : index
    %c0_4 = arith.constant 0 : index
    %2 = vector.load %arg3[%c0_2, %c0_3, %c0_4] : memref<1x4x256xf32, #tpu.memory_space<vmem>>, vector<1x4x256xf32>
    %3 = vector.shape_cast %2 : vector<1x4x256xf32> to vector<4x256xf32>
    %c0_5 = arith.constant 0 : index
    %c0_6 = arith.constant 0 : index
    %c0_7 = arith.constant 0 : index
    %4 = vector.load %arg4[%c0_5, %c0_6, %c0_7] : memref<1x1x256xbf16, #tpu.memory_space<vmem>>, vector<1x1x256xbf16>
    %5 = vector.shape_cast %4 : vector<1x1x256xbf16> to vector<1x256xbf16>
    %6 = arith.extf %5 : vector<1x256xbf16> to vector<1x256xf32>
    %cst = arith.constant -3.40282347E+38 : f32
    %7 = vector.broadcast %cst : f32 to vector<4x256xf32>
    %8 = arith.cmpf oge, %3, %7 : vector<4x256xf32>
    %cst_8 = arith.constant 3.40282347E+38 : f32
    %9 = vector.broadcast %cst_8 : f32 to vector<4x256xf32>
    %10 = arith.cmpf ole, %3, %9 : vector<4x256xf32>
    %11 = arith.andi %8, %10 : vector<4x256xi1>
    %12 = arith.extui %11 : vector<4x256xi1> to vector<4x256xi32>
    %13 = arith.sitofp %12 : vector<4x256xi32> to vector<4x256xf32>
    %cst_9 = arith.constant dense<0x7F800000> : vector<256xf32>
    %14 = vector.multi_reduction <minimumf>, %13, %cst_9 [0] : vector<4x256xf32> to vector<256xf32>
    %15 = vector.shape_cast %14 : vector<256xf32> to vector<1x256xf32>
    %16 = arith.cmpf oeq, %3, %3 : vector<4x256xf32>
    %cst_10 = arith.constant 0.000000e+00 : f32
    %17 = vector.broadcast %cst_10 : f32 to vector<4x256xf32>
    %18 = arith.select %16, %3, %17 : vector<4x256xi1>, vector<4x256xf32>
    %cst_11 = arith.constant -3.40282347E+38 : f32
    %cst_12 = arith.constant 3.40282347E+38 : f32
    %19 = vector.broadcast %cst_11 : f32 to vector<4x256xf32>
    %20 = arith.maximumf %19, %18 : vector<4x256xf32>
    %21 = vector.broadcast %cst_12 : f32 to vector<4x256xf32>
    %22 = arith.minimumf %21, %20 : vector<4x256xf32>
    %23 = arith.subf %1, %22 : vector<4x256xf32>
    %24 = math.absf %23 : vector<4x256xf32>
    %cst_13 = arith.constant dense<0.000000e+00> : vector<256xf32>
    %25 = vector.multi_reduction <add>, %24, %cst_13 [0] : vector<4x256xf32> to vector<256xf32>
    %26 = vector.shape_cast %25 : vector<256xf32> to vector<1x256xf32>
    %27 = arith.mulf %6, %15 : vector<1x256xf32>
    %28 = arith.mulf %26, %27 : vector<1x256xf32>
    %29 = arith.cmpf oeq, %28, %28 : vector<1x256xf32>
    %cst_14 = arith.constant 0.000000e+00 : f32
    %30 = vector.broadcast %cst_14 : f32 to vector<1x256xf32>
    %31 = arith.select %29, %28, %30 : vector<1x256xi1>, vector<1x256xf32>
    %c0_i32 = arith.constant 0 : i32
    %32 = arith.cmpi eq, %arg1, %c0_i32 : i32
    %33 = arith.extui %32 : i1 to i32
    %c0_i32_15 = arith.constant 0 : i32
    %34 = arith.cmpi ne, %33, %c0_i32_15 : i32
    scf.if %34 {
      %cst_30 = arith.constant 0.000000e+00 : f32
      %51 = vector.broadcast %cst_30 : f32 to vector<1x1x128xf32>
      %c0_31 = arith.constant 0 : index
      %c0_32 = arith.constant 0 : index
      %c0_33 = arith.constant 0 : index
      %52 = vector.load %arg5[%c0_31, %c0_32, %c0_33] : memref<1x1x128xf32, #tpu.memory_space<vmem>>, vector<1x1x128xf32>
      tpu.vector_store %arg5[%c0_31, %c0_32, %c0_33], %51 {strides = array<i32>} : memref<1x1x128xf32, #tpu.memory_space<vmem>>, vector<1x1x128xf32>,
      %cst_34 = arith.constant 0.000000e+00 : f32
      %53 = vector.broadcast %cst_34 : f32 to vector<1x1x128xf32>
      %c0_35 = arith.constant 0 : index
      %c0_36 = arith.constant 0 : index
      %c0_37 = arith.constant 0 : index
      %54 = vector.load %arg6[%c0_35, %c0_36, %c0_37] : memref<1x1x128xf32, #tpu.memory_space<vmem>>, vector<1x1x128xf32>
      tpu.vector_store %arg6[%c0_35, %c0_36, %c0_37], %53 {strides = array<i32>} : memref<1x1x128xf32, #tpu.memory_space<vmem>>, vector<1x1x128xf32>,
    } else {
    }
    %c0_16 = arith.constant 0 : index
    %c0_17 = arith.constant 0 : index
    %c0_18 = arith.constant 0 : index
    %35 = vector.load %arg5[%c0_16, %c0_17, %c0_18] : memref<1x1x128xf32, #tpu.memory_space<vmem>>, vector<1x1x128xf32>
    %36 = vector.shape_cast %31 : vector<1x256xf32> to vector<1x1x256xf32>
    %cst_19 = arith.constant dense<0.000000e+00> : vector<1xf32>
    %37 = vector.multi_reduction <add>, %36, %cst_19 [1, 2] : vector<1x1x256xf32> to vector<1xf32>
    %38 = vector.shape_cast %37 : vector<1xf32> to vector<1x1x1xf32>
    %39 = vector.extract %38[0, 0, 0] : f32 from vector<1x1x1xf32>
    %40 = vector.broadcast %39 : f32 to vector<1x1x128xf32>
    %41 = arith.addf %35, %40 : vector<1x1x128xf32>
    %c0_20 = arith.constant 0 : index
    %c0_21 = arith.constant 0 : index
    %c0_22 = arith.constant 0 : index
    %42 = vector.load %arg5[%c0_20, %c0_21, %c0_22] : memref<1x1x128xf32, #tpu.memory_space<vmem>>, vector<1x1x128xf32>
    tpu.vector_store %arg5[%c0_20, %c0_21, %c0_22], %41 {strides = array<i32>} : memref<1x1x128xf32, #tpu.memory_space<vmem>>, vector<1x1x128xf32>,
    %c0_23 = arith.constant 0 : index
    %c0_24 = arith.constant 0 : index
    %c0_25 = arith.constant 0 : index
    %43 = vector.load %arg6[%c0_23, %c0_24, %c0_25] : memref<1x1x128xf32, #tpu.memory_space<vmem>>, vector<1x1x128xf32>
    %44 = vector.shape_cast %27 : vector<1x256xf32> to vector<1x1x256xf32>
    %cst_26 = arith.constant dense<0.000000e+00> : vector<1xf32>
    %45 = vector.multi_reduction <add>, %44, %cst_26 [1, 2] : vector<1x1x256xf32> to vector<1xf32>
    %46 = vector.shape_cast %45 : vector<1xf32> to vector<1x1x1xf32>
    %47 = vector.extract %46[0, 0, 0] : f32 from vector<1x1x1xf32>
    %48 = vector.broadcast %47 : f32 to vector<1x1x128xf32>
    %49 = arith.addf %43, %48 : vector<1x1x128xf32>
    %c0_27 = arith.constant 0 : index
    %c0_28 = arith.constant 0 : index
    %c0_29 = arith.constant 0 : index
    %50 = vector.load %arg6[%c0_27, %c0_28, %c0_29] : memref<1x1x128xf32, #tpu.memory_space<vmem>>, vector<1x1x128xf32>
    tpu.vector_store %arg6[%c0_27, %c0_28, %c0_29], %49 {strides = array<i32>} : memref<1x1x128xf32, #tpu.memory_space<vmem>>, vector<1x1x128xf32>,
    return
  }
  func.func @transform_0(%arg0: i32, %arg1: i32) -> (i32, i32, i32) {
    %c0_i32 = arith.constant 0 : i32
    %c0_i32_0 = arith.constant 0 : i32
    return %arg0, %c0_i32, %arg1 : i32, i32, i32
  }
  func.func @transform_1(%arg0: i32, %arg1: i32) -> (i32, i32, i32) {
    %c0_i32 = arith.constant 0 : i32
    %c0_i32_0 = arith.constant 0 : i32
    return %arg0, %c0_i32, %arg1 : i32, i32, i32
  }
  func.func @transform_2(%arg0: i32, %arg1: i32) -> (i32, i32, i32) {
    %c0_i32 = arith.constant 0 : i32
    %c0_i32_0 = arith.constant 0 : i32
    return %arg0, %c0_i32, %arg1 : i32, i32, i32
  }
  func.func @transform_3(%arg0: i32, %arg1: i32) -> (i32, i32, i32) {
    %c0_i32 = arith.constant 0 : i32
    %c0_i32_0 = arith.constant 0 : i32
    %c0_i32_1 = arith.constant 0 : i32
    return %arg0, %c0_i32, %c0_i32_0 : i32, i32, i32
  }
  func.func @transform_4(%arg0: i32, %arg1: i32) -> (i32, i32, i32) {
    %c0_i32 = arith.constant 0 : i32
    %c0_i32_0 = arith.constant 0 : i32
    %c0_i32_1 = arith.constant 0 : i32
    return %arg0, %c0_i32, %c0_i32_0 : i32, i32, i32
  }
}

</mosaic_0001>

<bundles_post_ra>
// kernel: tpu_custom_call.1
= control target key start
LH: loop header
LB: loop body
LE: loop exit
PB: predicated region body
PF: predicated region fallthrough
CT: control target
= control target key end

     0   :  { %10 = vsyncpa [#allocation3], 0  ;;  %s1134_s0 = inlined_call_operand.hbm [shape: f32[2,4,256], index: 0, kind: input, shape index: {}]   ;;  %s1135_s1 = inlined_call_operand.hbm [shape: f32[2,4,256], index: 1, kind: input, shape index: {}]   ;;  %s1136_s2 = inlined_call_operand.vmem [shape: bf16[2,1,256], index: 2, kind: input, shape index: {}]   ;;  %s1137_s3 = inlined_call_operand.hbm [shape: f32[2,1,128], index: 3, kind: output, shape index: {0}]   ;;  %s1138_s4 = inlined_call_operand.hbm [shape: f32[2,1,128], index: 4, kind: output, shape index: {1}]  }
   0x1   :  { %12 = vsyncpa [#allocation3 + $0x1], 0 }
   0x2   :  { %13 = vsyncpa [#allocation6], 0 }
   0x3   :  { %15 = vsyncpa [#allocation6 + $0x1], 0 }
   0x4   :  { %16 = vsyncpa [#allocation4], 0 }
   0x5   :  { %18 = vsyncpa [#allocation4 + $0x1], 0 }
   0x6   :  { %19 = vsyncpa [#allocation9], 0 }
   0x7   :  { %21 = vsyncpa [#allocation9 + $0x1], 0  ;;  %s913_s15 = smov 0   ;;  %s915_s16 = smov 0  }
   0x8   :  { %s917_s17 = smov 0   ;;  %s919_s18 = smov 0  }
   0x9   :  { %s921_s19 = smov 0   ;;  %s923_s20 = smov 0  }
   0xa LB: > { %s610_s21 = sadd.s32 4294967295, %s880_s20   ;;  %s611_s22 = sadd.s32 4294967294, %s880_s20   ;;  %s880_s20 = sphi %s923_s20, %s27_s20   ;;  %s876_s19 = sphi %s921_s19, %s1150_s19   ;;  %s872_s18 = sphi %s919_s18, %s1149_s18   ;;  %s868_s17 = sphi %s917_s17, %s1148_s17   ;;  %s864_s16 = sphi %s915_s16, %s1147_s16   ;;  %s860_s15 = sphi %s913_s15, %s1146_s15  }
   0xb   : > { %s39_s23 = sadd.s32 1, %s876_s19  ;;  %s48_s24 = sadd.s32 1, %s868_s17 }
   0xc   : > { %p41_p0 = scmp.ge.s32.totalorder %s39_s23, 2  ;;  %p55_p1 = scmp.ne.s32.totalorder %s868_s17, %s864_s16 }
   0xd   : > { %p56_p2 = scmp.eq.s32.totalorder %s880_s20, 0  ;;  %p61_p3 = scmp.ne.s32.totalorder %s864_s16, %s860_s15 }
   0xe   : > { %s1152_s23 = smov (%p41_p0, %s39_s23), 0  ;;  %p62_p5 = scmp.eq.s32.totalorder %s610_s21, 0 }
   0xf   : > { %p954_p4 = por %p56_p2, %p55_p1  ;;  %s43_s26 = ssub.s32 %s876_s19, %s1152_s23 }
  0x10   : > { %p141_p6 = scmp.eq.s32.totalorder %s610_s21, 1  ;;  %p46_p7 = scmp.eq.s32.totalorder %s43_s26, 0 }
  0x11   : > { %p960_p8 = por %p62_p5, %p61_p3  ;;  %p147_p10 = scmp.eq.s32.totalorder %s611_s22, 1 }
  0x12   : > { %p964_p9 = por %p141_p6, %p55_p1  ;;  %p658_p13 = scmp.lt.s32.totalorder %s880_s20, 2 }
  0x13   : > { %s969_s29 = scalar_select %p46_p7, %s868_s17, %s48_s24  }
  0x14   : > { %p971_p11 = por %p147_p10, %p61_p3  ;;  %s978_s5 = sand.u32 1, %s868_s17  }
  0x15   : > { %s614_s6 = sshll.u32 %s978_s5, 3  ;;  %s630_s7 = sshll.u32 %s876_s19, 7 }
  0x16   : > { %s205_s10 = scalar_lea.hbm %s1134_s0, %s630_s7  ;;  %s197_s11 = scalar_lea.vmem [#allocation2], %s614_s6 }
  0x17   : > { %s207_s12 = sshll.u32 %s197_s11, 4  ;;  %p987_p0 = pnand %p658_p13, %p954_p4  ;;  %s208_s12 = int_to_ptr.vmem [resolvable:$true] %s207_s12 }
  0x18   : > { %p620_p1 = scmp.ge.s32.totalorder %s880_s20, 1  ;;  %p245_p2 = scmp.lt.s32.totalorder %s880_s20, 3 }
  0x19   : > { %s194_s14 = scalar_lea.sflag [#allocation3], %s978_s5  ;;  %p712_p3 = pneg %p987_p0 }
  0x1a   : > { %s723_s21 = scalar_lea.vmem %s208_s12, 128  ;;  %s882_s22 = smov [#allocation2]  }
  0x1b   : > { %p724_p5 = scmp.ne.s32.totalorder %s208_s12, %s723_s21  ;;  %s728_s24 = sshll.u32 %s882_s22, 4  ;;  %s729_s24 = int_to_ptr.vmem [resolvable:$false] %s728_s24 }
  0x1c   : > { %s730_s25 = scalar_lea.vmem %s729_s24, 256  ;;  %p731_p4 = scmp.lt.s32.totalorder %s208_s12, %s729_s24 }
  0x1d   : > { %p726_p6 = pnand %p724_p5, %p712_p3  ;;  %p732_p10 = scmp.lt.s32.totalorder %s730_s25, %s723_s21 }
  0x1f   : > { %p727_p7 = pneg %p726_p6  ;;  %p733_p13 = por %p732_p10, %p731_p4 }
  0x21   : > { %p734_p12 = pnand %p733_p13, %p727_p7 }
  0x23   : > { %737 = shalt.err (!%p734_p12)
}
  0x24   : > { %647 = dma.hbm_to_vmem [thread:$0]  (!%p987_p0), %s205_s10, 128, %s208_s12, %s194_s14  }
  0x25   : > { %p1005_p5 = pnand %p620_p1, %p245_p2  ;;  %s226_s11 = scalar_lea.hbm %s1135_s1, %s630_s7 }
  0x26   : > { %s218_s21 = scalar_lea.vmem [#allocation5], %s614_s6  ;;  %s215_s24 = scalar_lea.sflag [#allocation6], %s978_s5 }
  0x27   : > { %s228_s22 = sshll.u32 %s218_s21, 4  ;;  %s883_s10 = smov [#allocation5]   ;;  %s229_s22 = int_to_ptr.vmem [resolvable:$true] %s228_s22 }
  0x28   : > { %s751_s25 = scalar_lea.vmem %s229_s22, 128  ;;  %s756_s12 = sshll.u32 %s883_s10, 4  ;;  %s757_s12 = int_to_ptr.vmem [resolvable:$false] %s756_s12 }
  0x29   : > { %p752_p12 = scmp.ne.s32.totalorder %s229_s22, %s751_s25  ;;  %s758_s14 = scalar_lea.vmem %s757_s12, 256 }
  0x2a   : > { %p759_p1 = scmp.lt.s32.totalorder %s229_s22, %s757_s12  ;;  %p760_p2 = scmp.lt.s32.totalorder %s758_s14, %s751_s25 }
  0x2b   : > { %p754_p6 = pnand %p752_p12, %p712_p3 }
  0x2c   : > { %p761_p4 = por %p760_p2, %p759_p1 }
  0x2d   : > { %p755_p7 = pneg %p754_p6 }
  0x2f   : > { %p762_p10 = pnand %p761_p4, %p755_p7 }
  0x31   : > { %765 = shalt.err (!%p762_p10)
}
  0x32   : > { %650 = dma.hbm_to_vmem [thread:$0]  (!%p987_p0), %s226_s11, 128, %s229_s22, %s215_s24  }
  0x33   : > { %249 = sbr.rel (%p1005_p5) target bundleno = 332 (0x14c), region = 32  ;;  %s1021_s5 = sand.u32 (!%p1005_p5), 1, %s864_s16  }
  0x34   : > { %s621_s6 = sshll.u32 (!%p1005_p5), %s1021_s5, 3  ;;  %s252_s7 = scalar_lea.sflag (!%p1005_p5), [#allocation3], %s1021_s5 }
  0x35   : > { %s255_s8 = scalar_lea.vmem (!%p1005_p5), [#allocation2], %s621_s6 }
  0x38   : > { %843 = dma.done.wait (%p960_p8), %s252_s7, 128  }
  0x39   : > { %845 = vsyncadd (%p960_p8), %s252_s7, 4294967168  ;;  %s261_s13 = scalar_lea.sflag [#allocation6], %s1021_s5  ;;  %s264_s9 = scalar_lea.vmem [#allocation5], %s621_s6 }
  0x3a   : > { %847 = dma.done.wait (%p960_p8), %s261_s13, 128  }
  0x3b   : > { %849 = vsyncadd (%p960_p8), %s261_s13, 4294967168  ;;  %v317_v0 = vld [vmem:[%s264_s9] sm:$0xff]  ;;  %vm328_vm2 = vcmask 1043456   ;;  %p308_p0 = scmp.lt.s32.totalorder %s872_s18, 1  ;;  %v316_v1 = vld [vmem:[%s255_s8] sm:$0xff]  ;;  %v884_v3 = vmov 0.0   ;;  %v372_v16 = vlaneseq }
  0x3c   : > { %vm320_vm0 = vcmp.ge.f32.partialorder %v317_v0, -3.4028235e+38  ;;  %vm321_vm1 = vcmp.le.f32.partialorder %v317_v0, 3.4028235e+38  ;;  %vm343_vm3 = vcmp.eq.f32.partialorder %v317_v0, %v317_v0  ;;  %v885_v14 = vmov 1983009808  }
  0x3d   : > { %vm322_vm4 = vmand %vm320_vm0, %vm321_vm1  ;;  %v344_v2 = vsel %vm343_vm3, %v317_v0, 0.0  ;;  %s309_s27 = scalar_select %p308_p0, %s872_s18, 1  ;;  %v370_v15 = vunpack.c.l.s4 %v885_v14  ;;  %v373_v30 = vshrl.u32 %v372_v16, 7  ;;  %vm402_vm5 = vcmask 1040384  }
  0x3e   : > { %v624_v4 = vsel %vm322_vm4, 1.0, %v884_v3  ;;  %v625_v5 = vclamps-f32 %v344_v2, 3.4028235e+38  ;;  %s1045_s24 = scalar_lea.vmem [#allocation7], %s1021_s5  ;;  %s1050_s25 = scalar_lea.vmem [#allocation8], %s1021_s5 }
  0x3f   : > { %v326_v6 = vcombine.high %v624_v4, %v624_v4  ;;  %v329_v7 = vsel %vm328_vm2, %v624_v4, inf  ;;  %s623_s26 = sshll.u32 %s309_s27, 1  ;;  %v371_v29 = vunpack.c.0.s8 %v370_v15  ;;  %v381_v46 = vsub.s32 0, %v373_v30  ;;  %399 = vst [vmem:[%s1045_s24] sm:$0x1] %v884_v3  ;;  %400 = vst [vmem:[%s1050_s25] sm:$0x1] %v884_v3  ;;  %s626_s10 = sshll.u32 %s872_s18, 4 }
  0x40   : > { %v330_v8 = vrot.slane %v329_v7, 4  ;;  %v347_v9 = vsub.f32 %v316_v1, %v625_v5  ;;  %s314_s22 = scalar_lea.vmem %s1136_s2, %s623_s26  ;;  %v385_v47 = vsub.s32 2, %v373_v30  ;;  %s451_s12 = sshll.u32 %s1045_s24, 4  ;;  %s1064_s12 = int_to_ptr.vmem [resolvable:$true] %s451_s12 }
  0x41   : > { %v336_v10 = vsel %vm328_vm2, %v326_v6, inf  ;;  %v318_v35 = vld [vmem:[%s314_s22] sm:$0x3]  ;;  %v374_v39 = vsub.s32 %v371_v29, %v373_v30  ;;  %s1062_s8 = scalar_lea.hbm %s1137_s3, %s626_s10  ;;  %s464_s13 = sshll.u32 %s1050_s25, 4  ;;  %s465_s13 = int_to_ptr.vmem [resolvable:$true] %s464_s13 }
  0x42   : > { %v331_v11 = vmin.f32 %v329_v7, %v330_v8  ;;  %v337_v12 = vrot.slane %v336_v10, 4  ;;  %v348_v13 = vand.u32 2147483647, %v347_v9  ;;  %v319_v41 = vunpack.c.l.bf16 %v318_v35  ;;  %s435_s27 = scalar_lea.sflag [#allocation4], %s1021_s5  ;;  %s766_s26 = scalar_lea.vmem %s1064_s12, 16 }
  0x43   : > { %p767_p8 = scmp.ne.s32.totalorder %s1064_s12, %s766_s26  ;;  %s886_s11 = smov [#allocation7]  }
  0x44   : > { %v332_v17 = vrot.slane %v331_v11, 2  ;;  %v338_v18 = vmin.f32 %v336_v10, %v337_v12  ;;  %v350_v19 = vcombine.high %v348_v13, %v348_v13  ;;  %v352_v20 = vsel %vm328_vm2, %v348_v13, 0.0  ;;  %s770_s21 = sshll.u32 %s886_s11, 4  ;;  %s771_s21 = int_to_ptr.vmem [resolvable:$false] %s770_s21 }
  0x45   : > { %v353_v21 = vrot.slane %v352_v20, 4  ;;  %p768_p3 = pnand %p767_p8, %p964_p9  ;;  %s772_s22 = scalar_lea.vmem %s771_s21, 32 }
  0x46   : > { %v333_v22 = vmin.f32 %v331_v11, %v332_v17  ;;  %v339_v23 = vrot.slane %v338_v18, 2  ;;  %v359_v24 = vsel %vm328_vm2, %v350_v19, 0.0  ;;  %v401_v13 = vld [vmem:[%s1045_s24] sm:$0x1]  ;;  %p773_p5 = scmp.lt.s32.totalorder %s1064_s12, %s771_s21  ;;  %p774_p12 = scmp.lt.s32.totalorder %s772_s22, %s766_s26 }
  0x47   : > { %v354_v25 = vadd.f32 %v353_v21, %v352_v20  ;;  %v360_v26 = vrot.slane %v359_v24, 4  ;;  %v418_v16 = vld [vmem:[%s1050_s25] sm:$0x1]  ;;  %p769_p13 = pneg %p768_p3 }
  0x48   : > { %v334_v27 = vrot.slane %v333_v22, 1  ;;  %v340_v28 = vmin.f32 %v338_v18, %v339_v23  ;;  %p775_p6 = por %p774_p12, %p773_p5 }
  0x49   : > { %v355_v31 = vrot.slane %v354_v25, 2  ;;  %v361_v32 = vadd.f32 %v360_v26, %v359_v24 }
  0x4a   : > { %v335_v33 = vmin.f32 %v333_v22, %v334_v27  ;;  %v341_v34 = vrot.slane %v340_v28, 1  ;;  %p776_p7 = pnand %p775_p6, %p769_p13 }
  0x4b   : > { %v356_v36 = vadd.f32 %v355_v31, %v354_v25  ;;  %v362_v37 = vrot.slane %v361_v32, 2 }
  0x4c   : > { %v342_v38 = vmin.f32 %v340_v28, %v341_v34 }
  0x4d   : > { %v363_v40 = vadd.f32 %v362_v37, %v361_v32  ;;  %v357_v42 = vrot.slane %v356_v36, 1 }
  0x4e   : > { %v368_v43 = vcombine.low %v335_v33, %v342_v38 }
  0x4f   : > { %v364_v44 = vrot.slane %v363_v40, 1  ;;  %v358_v48 = vadd.f32 %v357_v42, %v356_v36 }
  0x50   : > { %v375_v45 = vrot.slane %v368_v43, %v374_v39 }
  0x51   : > { %v365_v49 = vadd.f32 %v364_v44, %v363_v40 }
  0x52   : > { %v377_v50 = vmul.f32 %v375_v45, %v319_v41 }
  0x54   : > { %v382_v51 = vrot.slane %v377_v50, %v381_v46  ;;  %v386_v52 = vrot.slane %v377_v50, %v385_v47 }
  0x56   : > { %v389_v53 = vmul.f32 %v382_v51, %v358_v48  ;;  %v390_v54 = vmul.f32 %v386_v52, %v365_v49  ;;  %v419_v59 = vsel %vm402_vm5, %v382_v51, 0.0  ;;  %v420_v60 = vsel %vm402_vm5, %v386_v52, 0.0 }
  0x57   : > { %v421_v62 = vadd.f32 %v420_v60, %v419_v59 }
  0x58   : > { %vm391_vm6 = vcmp.eq.f32.partialorder %v389_v53, %v389_v53  ;;  %vm392_vm7 = vcmp.eq.f32.partialorder %v390_v54, %v390_v54 }
  0x59   : > { %v393_v55 = vsel %vm391_vm6, %v389_v53, 0.0  ;;  %v394_v56 = vsel %vm392_vm7, %v390_v54, 0.0 }
  0x5a   : > { %v403_v57 = vsel %vm402_vm5, %v393_v55, 0.0  ;;  %v404_v58 = vsel %vm402_vm5, %v394_v56, 0.0 }
  0x5b   : > { %v405_v61 = vadd.f32 %v404_v58, %v403_v57 }
  0x5d   : > { %406 = vadd.xlane.f32.xlu0 %v405_v61 }
  0x61   : > { %422 = vadd.xlane.f32.xlu0 %v421_v62 }
  0xe6   : > { %v407_v63 = vpop.xlane.xlu0 %406 }
  0xe7   : > { %v408_v0 = vrot.slane %v407_v63, 4 }
  0xe9   : > { %v409_v1 = vadd.f32 %v408_v0, %v407_v63 }
  0xea   : > { %v423_v2 = vpop.xlane.xlu0 %422 }
  0xeb   : > { %v410_v4 = vrot.slane %v409_v1, 2  ;;  %v424_v5 = vrot.slane %v423_v2, 4 }
  0xed   : > { %v425_v6 = vadd.f32 %v424_v5, %v423_v2  ;;  %v411_v7 = vadd.f32 %v410_v4, %v409_v1 }
  0xef   : > { %v426_v8 = vrot.slane %v425_v6, 2  ;;  %v412_v9 = vrot.slane %v411_v7, 1 }
  0xf1   : > { %v427_v10 = vadd.f32 %v426_v8, %v425_v6  ;;  %v413_v11 = vadd.f32 %v412_v9, %v411_v7 }
  0xf3   : > { %632 = vpush %v413_v11  ;;  %v428_v3 = vrot.slane %v427_v10, 1 }
  0xf5   : > { %v429_v12 = vadd.f32 %v428_v3, %v427_v10 }
  0xf7   : > { %634 = vpush %v429_v12 }
 0x124   : > { %s633_s14 = spop %632 }
 0x125   : > { %v415_v14 = vstv %s633_s14 }
 0x126   : > { %v416_v15 = vadd.f32 %v415_v14, %v401_v13 }
 0x128   : > { %417 = vst [vmem:[%s1045_s24] sm:$0x1] %v416_v15  ;;  %s635_s9 = spop %634 }
 0x129   : > { %v431_v17 = vstv %s635_s9 }
 0x12a   : > { %779 = shalt.err (!%p776_p7)
}
 0x12b   : > { %s780_s24 = scalar_lea.hbm %s1062_s8, 16  ;;  %s784_s7 = scalar_lea.hbm %s1137_s3, 32 }
 0x12c   : > { %p781_p1 = scmp.ne.s32.totalorder %s1062_s8, %s780_s24  ;;  %p785_p10 = scmp.lt.s32.totalorder %s1062_s8, %s1137_s3 }
 0x12d   : > { %p786_p0 = scmp.lt.s32.totalorder %s784_s7, %s780_s24 }
 0x12e   : > { %p782_p2 = pnand %p781_p1, %p964_p9 }
 0x12f   : > { %p787_p8 = por %p786_p0, %p785_p10 }
 0x130   : > { %p783_p4 = pneg %p782_p2 }
 0x132   : > { %p788_p3 = pnand %p787_p8, %p783_p4 }
 0x134   : > { %791 = shalt.err (!%p788_p3)
}
 0x135   : > { %640 = dma.vmem_to_hbm [thread:$0]  (%p964_p9), %s1064_s12, 16, %s1062_s8, %s435_s27   ;;  %v432_v18 = vadd.f32 %v431_v17, %v418_v16 }
 0x136   : > { %s462_s22 = scalar_lea.hbm %s1138_s4, %s626_s10  ;;  %s439_s24 = scalar_lea.sflag [#allocation9], %s1021_s5 }
 0x137   : > { %433 = vst [vmem:[%s1050_s25] sm:$0x1] %v432_v18  ;;  %s792_s14 = scalar_lea.vmem %s465_s13, 16  ;;  %s887_s6 = smov [#allocation8]  }
 0x138   : > { %p793_p13 = scmp.ne.s32.totalorder %s465_s13, %s792_s14  ;;  %s796_s7 = sshll.u32 %s887_s6, 4  ;;  %s797_s7 = int_to_ptr.vmem [resolvable:$false] %s796_s7 }
 0x139   : > { %s798_s9 = scalar_lea.vmem %s797_s7, 32  ;;  %p799_p6 = scmp.lt.s32.totalorder %s465_s13, %s797_s7 }
 0x13a   : > { %p794_p5 = pnand %p793_p13, %p964_p9  ;;  %p800_p7 = scmp.lt.s32.totalorder %s798_s9, %s792_s14 }
 0x13c   : > { %p795_p12 = pneg %p794_p5  ;;  %p801_p1 = por %p800_p7, %p799_p6 }
 0x13e   : > { %p802_p2 = pnand %p801_p1, %p795_p12 }
 0x140   : > { %805 = shalt.err (!%p802_p2)
}
 0x141   : > { %s806_s18 = scalar_lea.hbm %s462_s22, 16  ;;  %s810_s10 = scalar_lea.hbm %s1138_s4, 32 }
 0x142   : > { %p807_p4 = scmp.ne.s32.totalorder %s462_s22, %s806_s18  ;;  %p811_p8 = scmp.lt.s32.totalorder %s462_s22, %s1138_s4 }
 0x143   : > { %p812_p3 = scmp.lt.s32.totalorder %s810_s10, %s806_s18 }
 0x144   : > { %p808_p10 = pnand %p807_p4, %p964_p9 }
 0x145   : > { %p813_p13 = por %p812_p3, %p811_p8 }
 0x146   : > { %p809_p0 = pneg %p808_p10 }
 0x148   : > { %p814_p5 = pnand %p813_p13, %p809_p0 }
 0x14a   : > { %817 = shalt.err (!%p814_p5)
}
 0x14b   : > { %641 = dma.vmem_to_hbm [thread:$0]  (%p964_p9), %s465_s13, 16, %s462_s22, %s439_s24  }
 0x14c PF: > { %s476_s27 = sand.u32 1, %s860_s15   ;;  %p1145_p12 = scmp.ge.s32.totalorder %s880_s20, 2 }
 0x14d   : > { %s477_s11 = scalar_lea.sflag [#allocation4], %s476_s27 }
 0x14e   : > { %p652_p6 = pnand %p1145_p12, %p971_p11 }
 0x150   : > { %p653_p7 = pneg %p652_p6 }
 0x152   : > { %851 = dma.done.wait (%p653_p7), %s477_s11, 16  }
 0x153   : > { %853 = vsyncadd (%p653_p7), %s477_s11, 4294967280  ;;  %s485_s26 = scalar_lea.sflag [#allocation9], %s476_s27 }
 0x154   : > { %855 = dma.done.wait (%p653_p7), %s485_s26, 16  }
 0x155   : > { %857 = vsyncadd (%p653_p7), %s485_s26, 4294967280  ;;  %s27_s20 = sadd.s32 1, %s880_s20   ;;  %s1146_s15 = smov %s864_s16 }
 0x156   : > { %p24_p1 = scmp.ge.s32.totalorder %s27_s20, 4   ;;  %s1147_s16 = smov %s868_s17 }
 0x157   : > { %s1148_s17 = smov %s969_s29  ;;  %s1149_s18 = smov %s876_s19 }
 0x158   : > { %s1150_s19 = smov %s1152_s23  ;;  %26 = sbr.rel (!%p24_p1) target bundleno = 10 (0xa), region = 114 }
 0x15d   :  { %489 = vsyncpa [#allocation3], 1 }
 0x15e   :  { %491 = vsyncpa [#allocation3 + $0x1], 1 }
 0x15f   :  { %492 = vsyncpa [#allocation6], 1 }
 0x160   :  { %494 = vsyncpa [#allocation6 + $0x1], 1 }
 0x161   :  { %495 = vsyncpa [#allocation4], 1 }
 0x162   :  { %497 = vsyncpa [#allocation4 + $0x1], 1 }
 0x163   :  { %498 = vsyncpa [#allocation9], 1 }
 0x164   :  { %500 = vsyncpa [#allocation9 + $0x1], 1 }

</bundles_post_ra>
